<compile_context>
chip_gen: v7x
topology: tpu7x:2x2x1
jax: 0.10.0
libtpu: 0.0.40
codegen_flags: <defaults>
</compile_context>

<pallas_src>
import functools

import jax
import jax.numpy as jnp
from jax.experimental import pallas as pl
from jax.experimental.pallas import tpu as pltpu


def _round_up(x, m):
    return ((x + m - 1) // m) * m


def _shapley_kernel(neigh_ref, inv_n_ref, a_ref, tgt_ref, out_ref, *,
                    alpha, samples):
    """One grid step == one block of TB targets.

    neigh_ref: [N, D]  bf16  (resident, single-buffered)
    inv_n_ref: [N, 1]  f32   1 / max(||neigh_i||, eps)   (resident)
    a_ref:     [N, N]  bf16/f32 predecessor counts        (resident)
    tgt_ref:   [D, TB] bf16  this block of targets (targets lane-dense)
    out_ref:   [N, TB] f32   softmax weights (lane-dense, unmasked stores)
    """
    neigh = neigh_ref[...]                                            # [N, D]
    tgt = tgt_ref[...]                                                # [D, TB]
    inv_n = inv_n_ref[...]                                            # [N, 1]

    eps = jnp.float32(1e-8)

    # Similarity dot on the MXU, f32 accumulation.
    dot = jnp.dot(neigh, tgt, preferred_element_type=jnp.float32)     # [N, TB]

    # Target norms in the [D, TB] layout: sublane reduce, no transpose needed.
    tgt32 = tgt.astype(jnp.float32)
    t_norm = jnp.sqrt(jnp.sum(tgt32 * tgt32, axis=0, keepdims=True))  # [1, TB]
    inv_t = 1.0 / jnp.maximum(t_norm, eps)                            # [1, TB]

    # Cosine similarity (torch.cosine_similarity, dim=-1, eps=1e-8 semantics).
    sim = dot * inv_n * inv_t                                         # [N, TB]

    # pref = sim ** alpha (torch.pow fractional-exponent semantics: NaN for
    # sim < 0, 0 for sim == 0).  EUP log + exp.
    pref = jnp.exp(jnp.float32(alpha) * jnp.log(sim))                 # [N, TB]

    # vals = (neigh_emb @ tgt_emb) * pref
    vals = dot * pref                                                 # [N, TB]

    # Monte-Carlo Shapley, closed form: shap = vals - (A @ vals) / S.
    # A stays in its stored dtype (bf16 counts <= 256 are exact); vals is cast
    # to the same dtype so the contraction runs natively on the MXU.
    prev = jnp.dot(a_ref[...], vals.astype(a_ref.dtype),
                   preferred_element_type=jnp.float32)                # [N, TB]
    shap = vals - prev * jnp.float32(1.0 / samples)                   # [N, TB]

    # Softmax over the N neighbors (sublane axis); exact normalization so each
    # column sums to 1 to f32 rounding.
    m = jnp.max(shap, axis=0, keepdims=True)                          # [1, TB]
    e = jnp.exp(shap - m)                                             # [N, TB]
    out_ref[...] = e / jnp.sum(e, axis=0, keepdims=True)              # [N, TB]


@functools.lru_cache(maxsize=None)
def _build_predecessor_matrix(seed, n, samples):
    """A[p, q] = #sampled permutations in which q immediately precedes p.

    Data-independent of the embeddings, so built once per (seed, n, samples)
    and cached.  Stored in bf16 when counts are exactly representable
    (samples <= 256), halving the A DMA / VMEM footprint.
    """
    # TODO(synk): numba's np.random permutation stream is not reproducible in
    # JAX; jax.random permutations give the same MC estimator, different draws.
    keys = jax.random.split(jax.random.PRNGKey(seed), samples)
    perms = jax.vmap(lambda k: jax.random.permutation(k, n))(keys)    # [S, N]
    succ = perms[:, 1:].reshape(-1)
    pred = perms[:, :-1].reshape(-1)
    A = jnp.zeros((n, n), jnp.float32).at[succ, pred].add(1.0)
    a_dtype = jnp.bfloat16 if samples <= 256 else jnp.float32
    return jax.block_until_ready(A.astype(a_dtype))


def preference_shapley_batched(neigh_emb, tgt_embs, *, samples=128, alpha=0.7,
                               perm_seed=42, max_block_targets=256):
    """Batched Pallas forward: grid over blocks of TB targets.

    neigh_emb: [N, D] float
    tgt_embs:  [B, D] float
    returns:   [B, N] float32 softmax weights

    max_block_targets: targets per grid step (rounded to a multiple of 128).
    256 fills the v6e/v7x 2x256x256 MXU; 128 already fills v5e's 4x128x128.
    """
    n, d = neigh_emb.shape
    b = tgt_embs.shape[0]

    # Lane-dense target-block size (multiple of 128) and padded batch.
    tb = _round_up(min(int(max_block_targets), _round_up(b, 128)), 128)
    b_pad = _round_up(b, tb)

    # bf16 MXU operands; f32 accumulation happens inside the kernel.
    neigh_bf = neigh_emb.astype(jnp.bfloat16)                         # [N, D]

    # Targets transposed to [D, B_pad] so each block [D, TB] feeds the MXU
    # directly and target norms reduce over sublanes (no in-kernel transposes).
    # Zero-padded columns stay finite (uniform softmax) and are sliced off.
    tgt_t = jnp.zeros((d, b_pad), jnp.bfloat16).at[:, :b].set(
        tgt_embs.astype(jnp.bfloat16).T)

    # Target-invariant neighbor inverse norms, hoisted out of the kernel (f32).
    neigh32 = neigh_emb.astype(jnp.float32)
    inv_n = 1.0 / jnp.maximum(
        jnp.sqrt(jnp.sum(neigh32 * neigh32, axis=-1, keepdims=True)),
        jnp.float32(1e-8))                                            # [N, 1]

    A = _build_predecessor_matrix(int(perm_seed), int(n), int(samples))

    kernel = functools.partial(_shapley_kernel, alpha=float(alpha),
                               samples=int(samples))

    grid = (b_pad // tb,)

    # VMEM budget: single-buffered residents + double-buffered tgt/out blocks
    # + slack for f32 intermediates.  Kept well under v7x's 64 MiB/TC.
    resident = n * d * 2 + n * 4 + n * n * A.dtype.itemsize
    per_step = 2 * (d * tb * 2 + n * tb * 4)
    need = resident + per_step + 6 * n * tb * 4
    vmem_limit = int(min(max(need + (8 << 20), 16 << 20), 40 << 20))
    # TODO(synk): if n*n*A.itemsize approaches this budget (v7x: 64 MiB/TC
    # physical), row-tile A over an extra "arbitrary" grid axis with a VMEM
    # accumulator instead of keeping it fully resident.

    cost = pl.CostEstimate(
        flops=int(b_pad * (2 * n * d + 2 * n * n + 12 * n)),
        transcendentals=int(b_pad * 3 * n),
        bytes_accessed=int(n * d * 2 + n * n * A.dtype.itemsize + n * 4
                           + b_pad * (d * 2 + n * 4)),
    )

    out = pl.pallas_call(
        kernel,
        out_shape=jax.ShapeDtypeStruct((n, b_pad), jnp.float32),
        grid_spec=pltpu.PrefetchScalarGridSpec(
            num_scalar_prefetch=0,
            grid=grid,
            in_specs=[
                # Resident, single-buffered inputs (constant block index).
                pl.BlockSpec((n, d), lambda i: (0, 0),
                             pipeline_mode=pl.Buffered(1)),           # neigh
                pl.BlockSpec((n, 1), lambda i: (0, 0),
                             pipeline_mode=pl.Buffered(1)),           # inv_n
                pl.BlockSpec((n, n), lambda i: (0, 0),
                             pipeline_mode=pl.Buffered(1)),           # A
                # Per-step target block (default double-buffered pipeline).
                pl.BlockSpec((d, tb), lambda i: (0, i)),
            ],
            out_specs=pl.BlockSpec((n, tb), lambda i: (0, i)),
        ),
        compiler_params=pltpu.CompilerParams(
            dimension_semantics=("parallel",),
            vmem_limit_bytes=vmem_limit,
        ),
        cost_estimate=cost,
    )(neigh_bf, inv_n, A, tgt_t)

    # Layout plumbing only: [N, B_pad] -> [B, N].
    return out[:, :b].T


def preference_shapley(neigh_emb, tgt_emb, *, samples=128, alpha=0.7,
                       perm_seed=42):
    """Single-target API matching PreferenceShapley.forward: returns [N]."""
    w = preference_shapley_batched(neigh_emb, tgt_emb[None, :], samples=samples,
                                   alpha=alpha, perm_seed=perm_seed)
    return w[0]


def _reference(neigh_emb, tgt_embs, A, samples, alpha):
    """Plain-JAX reference mirroring the kernel's precision policy
    (bf16-rounded embeddings / vals fed to the matmuls, f32 everywhere else)."""
    nb = neigh_emb.astype(jnp.bfloat16).astype(jnp.float32)
    tb_ = tgt_embs.astype(jnp.bfloat16).astype(jnp.float32)
    n32 = neigh_emb.astype(jnp.float32)
    inv_n = 1.0 / jnp.maximum(jnp.sqrt(jnp.sum(n32 * n32, axis=-1)), 1e-8)
    A32 = A.astype(jnp.float32)

    def one(t):
        dot = nb @ t
        inv_t = 1.0 / jnp.maximum(jnp.sqrt(jnp.sum(t * t)), 1e-8)
        sim = dot * inv_n * inv_t
        pref = jnp.exp(alpha * jnp.log(sim))
        vals = dot * pref
        prev = A32 @ vals.astype(jnp.bfloat16).astype(jnp.float32)
        shap = vals - prev / samples
        return jax.nn.softmax(shap)

    return jax.vmap(one)(tb_)


if __name__ == "__main__":
    key = jax.random.PRNGKey(0)
    k_neigh, k_tgt = jax.random.split(key, 2)

    N, D, B = 8, 32, 2
    # Positive embeddings so sim**alpha (fractional power) stays real, matching
    # any sensible use of the original module.
    neigh_emb = jax.random.uniform(k_neigh, (N, D), jnp.float32,
                                   minval=0.1, maxval=1.0)
    tgt_embs = jax.random.uniform(k_tgt, (B, D), jnp.float32,
                                  minval=0.1, maxval=1.0)

    # Batched path (grid over target blocks).
    w_b = preference_shapley_batched(neigh_emb, tgt_embs, samples=128,
                                     alpha=0.7, perm_seed=42)
    w_b = jax.block_until_ready(w_b)
    assert w_b.shape == (B, N)
    assert bool(jnp.isfinite(w_b).all())
    # Exact softmax normalization -> every row sums to 1.
    assert float(jnp.max(jnp.abs(jnp.sum(w_b, axis=-1) - 1.0))) < 1e-4

    # Single-target wrapper (original module signature) matches row 0.
    w0 = preference_shapley(neigh_emb, tgt_embs[0], samples=128, alpha=0.7,
                            perm_seed=42)
    w0 = jax.block_until_ready(w0)
    assert w0.shape == (N,)
    assert bool(jnp.allclose(w0, w_b[0], atol=1e-5, rtol=1e-5))

    # Plain-JAX reference with the same predecessor matrix and precision policy.
    A = _build_predecessor_matrix(42, N, 128)
    w_ref = _reference(neigh_emb, tgt_embs, A, 128, 0.7)
    assert bool(jnp.allclose(w_b, w_ref, atol=5e-3, rtol=5e-3))

    print("KERNEL_OK")
</pallas_src>

<mosaic_0001>
module attributes {stable_mosaic.version = 11 : i64} {
  func.func @_shapley_kernel(%arg0: i32, %arg1: memref<8x32xbf16, #tpu.memory_space<vmem>>, %arg2: memref<8x1xf32, #tpu.memory_space<vmem>>, %arg3: memref<8x8xbf16, #tpu.memory_space<vmem>>, %arg4: memref<32x128xbf16, #tpu.memory_space<vmem>>, %arg5: memref<8x128xf32, #tpu.memory_space<vmem>>) attributes {dimension_semantics = [#tpu.dimension_semantics<parallel>], iteration_bounds = array<i64: 1>, scalar_prefetch = 0 : i64, scratch_operands = 0 : i64, tpu.core_type = #tpu.core_type<tc>, window_params = [{pipeline_mode = #tpu.pipeline_mode<synchronous>, transform_indices = @transform_0, window_bounds = array<i64: 8, 32>}, {pipeline_mode = #tpu.pipeline_mode<synchronous>, transform_indices = @transform_1, window_bounds = array<i64: 8, 1>}, {pipeline_mode = #tpu.pipeline_mode<synchronous>, transform_indices = @transform_2, window_bounds = array<i64: 8, 8>}, {transform_indices = @transform_3, window_bounds = array<i64: 32, 128>}, {transform_indices = @transform_4, window_bounds = array<i64: 8, 128>}]} {
    %c0 = arith.constant 0 : index
    %c0_0 = arith.constant 0 : index
    %0 = vector.load %arg1[%c0, %c0_0] : memref<8x32xbf16, #tpu.memory_space<vmem>>, vector<8x32xbf16>
    %c0_1 = arith.constant 0 : index
    %c0_2 = arith.constant 0 : index
    %1 = vector.load %arg4[%c0_1, %c0_2] : memref<32x128xbf16, #tpu.memory_space<vmem>>, vector<32x128xbf16>
    %c0_3 = arith.constant 0 : index
    %c0_4 = arith.constant 0 : index
    %2 = vector.load %arg2[%c0_3, %c0_4] : memref<8x1xf32, #tpu.memory_space<vmem>>, vector<8x1xf32>
    %cst = arith.constant dense<0.000000e+00> : vector<8x128xf32>
    %3 = tpu.matmul %0, %1, %cst {dimension_numbers = #tpu.dot_dimension_numbers<[1], [0], [0], [1], [0, 0, 1, 1], [], []>} : vector<8x32xbf16>, vector<32x128xbf16>, vector<8x128xf32> -> vector<8x128xf32>
    %4 = arith.extf %1 : vector<32x128xbf16> to vector<32x128xf32>
    %5 = arith.mulf %4, %4 : vector<32x128xf32>
    %cst_5 = arith.constant dense<0.000000e+00> : vector<128xf32>
    %6 = vector.multi_reduction <add>, %5, %cst_5 [0] : vector<32x128xf32> to vector<128xf32>
    %7 = vector.shape_cast %6 : vector<128xf32> to vector<1x128xf32>
    %8 = math.sqrt %7 : vector<1x128xf32>
    %cst_6 = arith.constant 9.99999993E-9 : f32
    %9 = vector.broadcast %cst_6 : f32 to vector<1x128xf32>
    %10 = arith.maximumf %8, %9 : vector<1x128xf32>
    %cst_7 = arith.constant 1.000000e+00 : f32
    %11 = vector.broadcast %cst_7 : f32 to vector<1x128xf32>
    %12 = arith.divf %11, %10 : vector<1x128xf32>
    %13 = vector.broadcast %2 : vector<8x1xf32> to vector<8x128xf32>
    %14 = arith.mulf %3, %13 : vector<8x128xf32>
    %15 = vector.broadcast %12 : vector<1x128xf32> to vector<8x128xf32>
    %16 = arith.mulf %14, %15 : vector<8x128xf32>
    %17 = math.log %16 : vector<8x128xf32>
    %cst_8 = arith.constant 0.699999988 : f32
    %18 = vector.broadcast %cst_8 : f32 to vector<8x128xf32>
    %19 = arith.mulf %18, %17 : vector<8x128xf32>
    %20 = math.exp %19 : vector<8x128xf32>
    %21 = arith.mulf %3, %20 : vector<8x128xf32>
    %c0_9 = arith.constant 0 : index
    %c0_10 = arith.constant 0 : index
    %22 = vector.load %arg3[%c0_9, %c0_10] : memref<8x8xbf16, #tpu.memory_space<vmem>>, vector<8x8xbf16>
    %23 = arith.truncf %21 : vector<8x128xf32> to vector<8x128xbf16>
    %cst_11 = arith.constant dense<0.000000e+00> : vector<8x128xf32>
    %24 = tpu.matmul %22, %23, %cst_11 {dimension_numbers = #tpu.dot_dimension_numbers<[1], [0], [0], [1], [0, 0, 1, 1], [], []>} : vector<8x8xbf16>, vector<8x128xbf16>, vector<8x128xf32> -> vector<8x128xf32>
    %cst_12 = arith.constant 7.812500e-03 : f32
    %25 = vector.broadcast %cst_12 : f32 to vector<8x128xf32>
    %26 = arith.mulf %24, %25 : vector<8x128xf32>
    %27 = arith.subf %21, %26 : vector<8x128xf32>
    %cst_13 = arith.constant dense<0xFF800000> : vector<128xf32>
    %28 = vector.multi_reduction <maximumf>, %27, %cst_13 [0] : vector<8x128xf32> to vector<128xf32>
    %29 = vector.shape_cast %28 : vector<128xf32> to vector<1x128xf32>
    %30 = vector.broadcast %29 : vector<1x128xf32> to vector<8x128xf32>
    %31 = arith.subf %27, %30 : vector<8x128xf32>
    %32 = math.exp %31 : vector<8x128xf32>
    %cst_14 = arith.constant dense<0.000000e+00> : vector<128xf32>
    %33 = vector.multi_reduction <add>, %32, %cst_14 [0] : vector<8x128xf32> to vector<128xf32>
    %34 = vector.shape_cast %33 : vector<128xf32> to vector<1x128xf32>
    %35 = vector.broadcast %34 : vector<1x128xf32> to vector<8x128xf32>
    %36 = arith.divf %32, %35 : vector<8x128xf32>
    %c0_15 = arith.constant 0 : index
    %c0_16 = arith.constant 0 : index
    %37 = vector.load %arg5[%c0_15, %c0_16] : memref<8x128xf32, #tpu.memory_space<vmem>>, vector<8x128xf32>
    tpu.vector_store %arg5[%c0_15, %c0_16], %36 {strides = array<i32>} : memref<8x128xf32, #tpu.memory_space<vmem>>, vector<8x128xf32>,
    return
  }
  func.func @transform_0(%arg0: i32) -> (i32, i32) {
    %c0_i32 = arith.constant 0 : i32
    %c0_i32_0 = arith.constant 0 : i32
    %c0_i32_1 = arith.constant 0 : i32
    return %c0_i32, %c0_i32_0 : i32, i32
  }
  func.func @transform_1(%arg0: i32) -> (i32, i32) {
    %c0_i32 = arith.constant 0 : i32
    %c0_i32_0 = arith.constant 0 : i32
    %c0_i32_1 = arith.constant 0 : i32
    return %c0_i32, %c0_i32_0 : i32, i32
  }
  func.func @transform_2(%arg0: i32) -> (i32, i32) {
    %c0_i32 = arith.constant 0 : i32
    %c0_i32_0 = arith.constant 0 : i32
    %c0_i32_1 = arith.constant 0 : i32
    return %c0_i32, %c0_i32_0 : i32, i32
  }
  func.func @transform_3(%arg0: i32) -> (i32, i32) {
    %c0_i32 = arith.constant 0 : i32
    %c0_i32_0 = arith.constant 0 : i32
    return %c0_i32, %arg0 : i32, i32
  }
  func.func @transform_4(%arg0: i32) -> (i32, i32) {
    %c0_i32 = arith.constant 0 : i32
    %c0_i32_0 = arith.constant 0 : i32
    return %c0_i32, %arg0 : i32, i32
  }
}

</mosaic_0001>

<bundles_post_ra>
// kernel: tpu_custom_call.1
= control target key start
LH: loop header
LB: loop body
LE: loop exit
PB: predicated region body
PF: predicated region fallthrough
CT: control target
= control target key end

     0   :  { %9 = vsyncpa [#allocation3], 0  ;;  %s377_s0 = inlined_call_operand.vmem [shape: bf16[8,32], index: 0, kind: input, shape index: {}]   ;;  %s378_s1 = inlined_call_operand.vmem [shape: f32[8,1], index: 1, kind: input, shape index: {}]   ;;  %s379_s2 = inlined_call_operand.hbm [shape: bf16[8,8], index: 2, kind: input, shape index: {}]   ;;  %s380_s3 = inlined_call_operand.vmem [shape: bf16[32,128], index: 3, kind: input, shape index: {}]   ;;  %s381_s4 = inlined_call_operand.hbm [shape: f32[8,128], index: 4, kind: output, shape index: {}]  }
   0x1   :  { %10 = vsyncpa [#allocation4], 0  ;;  %s311_s15 = smov [#allocation2]   ;;  %s263_s19 = scalar_lea.hbm %s379_s2, 64 }
   0x2   :  { %s21_s16 = sshll.u32 %s311_s15, 4  ;;  %p264_p0 = scmp.ne.s32.totalorder %s379_s2, %s263_s19  ;;  %s22_s16 = int_to_ptr.vmem [resolvable:$true] %s21_s16 }
   0x3   :  { %p267_p1 = scmp.lt.u32.totalorder %s263_s19, %s379_s2 }
   0x5   :  { %p269_p2 = pnand %p267_p1, %p264_p0 }
   0x7   :  { %272 = shalt.err (!%p269_p2)
}
   0x8   :  { %s273_s24 = scalar_lea.vmem %s22_s16, 64  ;;  %p278_p4 = scmp.lt.s32.totalorder %s22_s16, %s22_s16 }
   0x9   :  { %p274_p3 = scmp.ne.s32.totalorder %s22_s16, %s273_s24  ;;  %p279_p5 = scmp.lt.s32.totalorder %s273_s24, %s273_s24 }
   0xb   :  { %p280_p6 = por %p279_p5, %p278_p4 }
   0xd   :  { %p281_p7 = pnand %p280_p6, %p274_p3 }
   0xf   :  { %284 = shalt.err (!%p281_p7)
}
  0x10   :  { %24 = dma.hbm_to_vmem [thread:$0]  %s379_s2, 64, %s22_s16, [#allocation3]  }
  0x11   :  { %307 = dma.done.wait [#allocation3], 64  }
  0x12   :  { %308 = vsyncadd [#allocation3], 4294967232  ;;  %v312_v0 = vmov 0.0   ;;  %vm313_vm0 = vmmov 0   ;;  %v314_v1 = vmov 0   ;;  %v32_v2 = vld [vmem:[%s380_s3] sm:$0xff]  }
  0x13   :  { %227 = vmatprep.subr.bf16.mxu0 %v312_v0  ;;  %231 = vmatprep.mubr.msk.bf16.mxu0 %vm313_vm0, %v312_v0  ;;  %v34_v3 = vld [vmem:[%s380_s3 + $0x8] sm:$0xff]   ;;  %v93_v4 = vunpack.c.l.bf16 %v32_v2  ;;  %v94_v5 = vunpack.c.h.bf16 %v32_v2  ;;  %v36_v6 = vld [vmem:[%s378_s1] sm:$0xff]  ;;  %vm49_vm1 = vcmask 261120   ;;  %vm139_vm4 = vcmask 1043456  }
  0x14   :  { %246 = vset.pattern.permute.xlu0 %v314_v1  ;;  %235 = vmatprep.subr.bf16.mxu1 %v312_v0  ;;  %v95_v7 = vunpack.c.l.bf16 %v34_v3  ;;  %v96_v8 = vunpack.c.h.bf16 %v34_v3  ;;  %v31_v15 = vld [vmem:[%s377_s0] sm:$0xf]  ;;  %vm135_vm5 = vcmask 64512   ;;  %s315_s0 = smov [#allocation5]  }
  0x15   :  { %237 = vmatprep.mubr.msk.bf16.mxu1 %vm313_vm0, %v312_v0  ;;  %122 = vperm.xlu0 %246, %v36_v6   ;;  %v97_v9 = vmul.f32 %v93_v4, %v93_v4  ;;  %v98_v10 = vmul.f32 %v94_v5, %v94_v5  ;;  %v133_v45 = vld [vmem:[#allocation2] sm:$0xf]  ;;  %s209_s1 = sshll.u32 %s315_s0, 4  ;;  %s210_s1 = int_to_ptr.vmem [resolvable:$true] %s209_s1 }
  0x16   :  { %228 = vmatpush3.bf16.msra.mxu0 %v32_v2  ;;  %v99_v11 = vmul.f32 %v95_v7, %v95_v7  ;;  %v100_v13 = vmul.f32 %v96_v8, %v96_v8  ;;  %s285_s7 = scalar_lea.vmem %s210_s1, 128  ;;  %p290_p9 = scmp.lt.s32.totalorder %s210_s1, %s210_s1 }
  0x17   :  { %229 = vmatprep.subr.bf16.mxu0 %v312_v0  ;;  %v101_v12 = vadd.f32 %v98_v10, %v97_v9  ;;  %p286_p8 = scmp.ne.s32.totalorder %s210_s1, %s285_s7  ;;  %p291_p10 = scmp.lt.s32.totalorder %s285_s7, %s285_s7 }
  0x19   :  { %v102_v14 = vadd.f32 %v101_v12, %v99_v11  ;;  %p292_p11 = por %p291_p10, %p290_p9 }
  0x1a   :  { %230 = vmatpush3.bf16.msra.mxu0 %v34_v3 }
  0x1b   :  { %v103_v16 = vadd.f32 %v102_v14, %v100_v13  ;;  %p293_p12 = pnand %p292_p11, %p286_p8 }
  0x1d   :  { %232 = vmatmul.mubr.msk.bf16.vlgmr.msra.gmra.mrb[0].mxu0 %vm49_vm1, %v31_v15  ;;  %v104_v17 = vrot.slane %v103_v16, 4 }
  0x1f   :  { %v105_v18 = vadd.f32 %v104_v17, %v103_v16 }
  0x21   :  { %v106_v19 = vrot.slane %v105_v18, 2 }
  0x23   :  { %v107_v20 = vadd.f32 %v106_v19, %v105_v18 }
  0x25   :  { %v108_v21 = vrot.slane %v107_v20, 1 }
  0x27   :  { %v109_v22 = vadd.f32 %v108_v21, %v107_v20 }
  0x29   :  { %251 = vrsqrt.f32 %v109_v22  ;;  %vm112_vm2 = vcmp.eq.f32.partialorder %v109_v22, inf  ;;  %v115_v25 = vand.u32 2147483648, %v109_v22  ;;  %vm114_vm3 = vcmp.eq.f32.partialorder %v109_v22, 0.0 }
  0x33   :  { %v252_v23 = vpop.eup %251 }
  0x34   :  { %v111_v24 = vmul.f32 %v252_v23, %v109_v22 }
  0x36   :  { %v113_v26 = vsel %vm112_vm2, %v109_v22, %v111_v24 }
  0x37   :  { %v116_v27 = vsel %vm114_vm3, %v115_v25, %v113_v26 }
  0x38   :  { %v117_v28 = vmax.f32 %v116_v27, 1e-08 }
  0x3a   :  { %253 = vrcp.f32 %v117_v28 }
  0x44   :  { %v254_v30 = vpop.eup %253 }
  0x94   :  { %v123_v29 = vpop.permute.xlu0 %122 }
  0xf0   :  { %v87_v31 = vpop.f32.mrb[0].mxu0 }
  0xf1   :  { %v125_v32 = vmul.f32 %v123_v29, %v87_v31  ;;  %v233_v33 = vpop.f32.mrb[1].mxu0 }
  0xf2   :  { %v90_v34 = vpop.f32.mrb[2].mxu0 }
  0xf3   :  { %v126_v35 = vmul.f32 %v254_v30, %v125_v32  ;;  %v234_v36 = vpop.f32.mrb[3].mxu0 }
  0xf5   :  { %255 = vlog2.f32 %v126_v35 }
  0xff   :  { %v256_v37 = vpop.eup %255 }
 0x100   :  { %v128_v38 = vmul.f32 0.6931472, %v256_v37 }
 0x102   :  { %v129_v39 = vmul.f32 0.7, %v128_v38 }
 0x104   :  { %v130_v40 = vmul.f32 1.442695, %v129_v39 }
 0x106   :  { %257 = vpow2.f32 %v130_v40 }
 0x110   :  { %v258_v41 = vpop.eup %257 }
 0x111   :  { %v132_v42 = vmul.f32 %v258_v41, %v87_v31 }
 0x113   :  { %v134_v43 = vpack.c.bf16 %v132_v42, %v132_v42 }
 0x115   :  { %v141_v44 = vsel %vm139_vm4, %v134_v43, 0 }
 0x116   :  { %236 = vmatpush3.bf16.msra.mxu1 %v141_v44 }
 0x119   :  { %238 = vmatmul.mubr.msk.bf16.vlgmr.msra.gmra.mrb[0].mxu1 %vm135_vm5, %v133_v45 }
 0x1ec   :  { %v177_v46 = vpop.f32.mrb[0].mxu1 }
 0x1ed   :  { %v183_v47 = vmul.f32 0.0078125, %v177_v46  ;;  %v239_v48 = vpop.f32.mrb[1].mxu1 }
 0x1ee   :  { %v180_v49 = vpop.f32.mrb[2].mxu1 }
 0x1ef   :  { %v184_v50 = vsub.f32 %v132_v42, %v183_v47  ;;  %v240_v51 = vpop.f32.mrb[3].mxu1 }
 0x1f1   :  { %v185_v52 = vrot.slane %v184_v50, 4 }
 0x1f3   :  { %v186_v53 = vmax.f32 %v184_v50, %v185_v52 }
 0x1f5   :  { %v187_v54 = vrot.slane %v186_v53, 2 }
 0x1f7   :  { %v188_v55 = vmax.f32 %v186_v53, %v187_v54 }
 0x1f9   :  { %v189_v56 = vrot.slane %v188_v55, 1 }
 0x1fb   :  { %v190_v57 = vmax.f32 %v188_v55, %v189_v56 }
 0x1fd   :  { %v191_v58 = vsub.f32 %v184_v50, %v190_v57 }
 0x1ff   :  { %v192_v59 = vmul.f32 1.442695, %v191_v58 }
 0x201   :  { %259 = vpow2.f32 %v192_v59 }
 0x20b   :  { %v260_v60 = vpop.eup %259 }
 0x20c   :  { %v194_v61 = vrot.slane %v260_v60, 4 }
 0x20e   :  { %v195_v62 = vadd.f32 %v260_v60, %v194_v61 }
 0x210   :  { %v196_v63 = vrot.slane %v195_v62, 2 }
 0x212   :  { %v197_v0 = vadd.f32 %v196_v63, %v195_v62 }
 0x214   :  { %v198_v1 = vrot.slane %v197_v0, 1 }
 0x216   :  { %v199_v2 = vadd.f32 %v198_v1, %v197_v0 }
 0x218   :  { %261 = vrcp.f32 %v199_v2 }
 0x222   :  { %v262_v3 = vpop.eup %261 }
 0x223   :  { %v201_v4 = vmul.f32 %v262_v3, %v260_v60 }
 0x225   :  { %202 = vst [vmem:[#allocation5] sm:$0xff] %v201_v4 }
 0x226   :  { %296 = shalt.err (!%p293_p12)
}
 0x227   :  { %s297_s10 = scalar_lea.hbm %s381_s4, 128 }
 0x228   :  { %p298_p13 = scmp.ne.s32.totalorder %s381_s4, %s297_s10  ;;  %p301_p0 = scmp.lt.u32.totalorder %s297_s10, %s381_s4 }
 0x22a   :  { %p303_p1 = pnand %p301_p0, %p298_p13 }
 0x22c   :  { %306 = shalt.err (!%p303_p1)
}
 0x22d   :  { %212 = dma.vmem_to_hbm [thread:$0]  %s210_s1, 128, %s381_s4, [#allocation4]  }
 0x22e   :  { %309 = dma.done.wait [#allocation4], 128  }
 0x22f   :  { %310 = vsyncadd [#allocation4], 4294967168 }
 0x230   :  { %216 = vsyncpa [#allocation3], 1 }
 0x231   :  { %217 = vsyncpa [#allocation4], 1 }

</bundles_post_ra>
